<compile_context>
chip_gen: v5e
topology: v5e:2x2
jax: 0.10.0
libtpu: 0.0.40
codegen_flags: <defaults>
</compile_context>

<pallas_src>
import jax
import jax.numpy as jnp
from jax.experimental import pallas as pl
from jax.experimental.pallas import tpu as pltpu


def _round_up(a: int, b: int) -> int:
    return (a + b - 1) // b * b


def _linear_kernel(x_ref, w_ref, b_ref, o_ref, acc_ref):
    # x_ref: (TM, TK)  w_ref: (TK, NP)  b_ref: (1, NP)
    # o_ref: (TM, n_class)  acc_ref: (TM, NP) f32 scratch
    k = pl.program_id(1)

    @pl.when(k == 0)
    def _init():
        # Initialize the accumulator with the (broadcast) bias once per batch tile.
        acc_ref[...] = jnp.broadcast_to(b_ref[...], acc_ref.shape)

    acc_ref[...] += jnp.dot(
        x_ref[...],
        w_ref[...],
        preferred_element_type=jnp.float32,
        precision=jax.lax.Precision.HIGHEST,
    )

    @pl.when(k == pl.num_programs(1) - 1)
    def _store():
        nc = o_ref.shape[-1]
        # Single narrow (lane-masked) store of only the real classes.
        o_ref[...] = acc_ref[...][:, :nc].astype(o_ref.dtype)


def prepare_logistic_params(weight, bias):
    """Pad nn.Linear params once (hoisted out of the per-call forward).

    weight: (n_class, in_dim)  PyTorch layout
    bias  : (n_class,)
    returns: (w_padded (in_dim, NP), b_padded (1, NP), n_class)
    """
    n_class, in_dim = weight.shape
    # Lane-dense class dim for the MXU / accumulator. Only go beyond 128 when
    # the real class count needs it (padding to 256 for tiny n_class would just
    # add HBM bytes on a memory-bound kernel).
    NP = 128 if n_class <= 128 else _round_up(n_class, 256)
    w_p = jnp.zeros((in_dim, NP), weight.dtype).at[:, :n_class].set(weight.T)
    b_p = jnp.zeros((1, NP), bias.dtype).at[0, :n_class].set(bias)
    return w_p, b_p, n_class


def logistic_regression_forward(x, w_padded, b_padded, n_class, *,
                                block_m: int = 512, block_k: int | None = None):
    """Forward pass: out = x @ weight.T + bias  (shape (B, n_class)).

    x        : (B, in_dim)       float32
    w_padded : (in_dim, NP)      padded transposed weight from prepare_logistic_params
    b_padded : (1, NP)           padded bias
    """
    B, in_dim = x.shape
    NP = w_padded.shape[1]
    itemsize = jnp.dtype(x.dtype).itemsize

    # --- Batch tile: multiple of 8 sublanes; keep >=2 tiles when B allows so the
    # "parallel" batch axis can feed both v7x TensorCores. Ragged last tile is fine.
    TM = min(block_m, max(8, _round_up(-(-B // 2), 8)))
    TM = _round_up(TM, 8)
    num_m = pl.cdiv(B, TM)

    # --- VMEM working-set estimate for a candidate K tile (double-buffered streams).
    def vmem_bytes(tk):
        x_buf = 2 * TM * tk * itemsize
        w_buf = 2 * tk * NP * itemsize
        b_buf = 2 * NP * itemsize
        o_buf = 2 * TM * _round_up(n_class, 128) * itemsize
        acc = TM * NP * 4
        return x_buf + w_buf + b_buf + o_buf + acc

    VMEM_BUDGET = 40 * 1024 * 1024  # usable budget; leaves headroom on v7x's 64 MiB

    # --- K tiling: only when the full-K working set would blow VMEM (or forced).
    TK = in_dim
    if block_k is not None and block_k % 128 == 0 and in_dim % block_k == 0:
        TK = block_k
    elif vmem_bytes(in_dim) > VMEM_BUDGET:
        for cand in (8192, 4096, 2048, 1024, 512, 256, 128):
            if in_dim % cand == 0 and vmem_bytes(cand) <= VMEM_BUDGET:
                TK = cand
                break
        # If no aligned divisor fits, fall back to full K (compiler handles it).
    num_k = in_dim // TK if in_dim % TK == 0 else 1
    if num_k == 1:
        TK = in_dim

    vmem_limit = int(min(max(vmem_bytes(TK) * 1.2 + (2 << 20), 16 * 1024 * 1024),
                         48 * 1024 * 1024))

    grid = (num_m, num_k)

    flops = 2 * B * in_dim * NP
    bytes_accessed = itemsize * (B * in_dim + in_dim * NP + NP + B * n_class)

    out = pl.pallas_call(
        _linear_kernel,
        out_shape=jax.ShapeDtypeStruct((B, n_class), x.dtype),
        grid=grid,
        in_specs=[
            # x streams over (batch tile, K tile); pipelined by BlockSpec machinery.
            pl.BlockSpec((TM, TK), lambda i, k: (i, k)),
            # Weight: streams over K (resident across the grid when num_k == 1).
            pl.BlockSpec((TK, NP), lambda i, k: (k, 0)),
            # Bias: VMEM-resident across all grid steps.
            pl.BlockSpec((1, NP), lambda i, k: (0, 0)),
        ],
        # Narrow output block: last dim == full array dim (n_class) is legal.
        out_specs=pl.BlockSpec((TM, n_class), lambda i, k: (i, 0)),
        scratch_shapes=[pltpu.VMEM((TM, NP), jnp.float32)],
        compiler_params=pltpu.CompilerParams(
            dimension_semantics=("parallel", "arbitrary"),
            vmem_limit_bytes=vmem_limit,
        ),
        cost_estimate=pl.CostEstimate(
            flops=flops, transcendentals=0, bytes_accessed=bytes_accessed),
    )(x, w_padded, b_padded)

    return out


if __name__ == "__main__":
    # Shapes consistent with the module: batch=32, in_dim=64, n_class=10.
    batch, in_dim, n_class = 32, 64, 10

    key = jax.random.PRNGKey(0)
    kx, kw, kb, kw2, kx2 = jax.random.split(key, 5)

    # Deterministic init mimicking nn.Linear's uniform(-1/sqrt(in_dim), 1/sqrt(in_dim)).
    bound = 1.0 / (in_dim ** 0.5)
    weight = jax.random.uniform(kw, (n_class, in_dim), jnp.float32, -bound, bound)
    bias = jax.random.uniform(kb, (n_class,), jnp.float32, -bound, bound)
    x = jax.random.normal(kx, (batch, in_dim), jnp.float32)

    ref = x @ weight.T + bias

    # Pad weight/bias once (hoisted out of the forward).
    w_p, b_p, nc = prepare_logistic_params(weight, bias)

    # 1) Default path: 2 batch tiles (TM=16), single K tile.
    out = jax.block_until_ready(logistic_regression_forward(x, w_p, b_p, nc))
    assert out.shape == (batch, n_class)
    assert jnp.allclose(out, ref, atol=1e-4, rtol=1e-4)

    # 2) Ragged last batch tile (B=13, TM=8 -> last tile has 5 valid rows).
    x_r = x[:13]
    out_r = jax.block_until_ready(logistic_regression_forward(x_r, w_p, b_p, nc))
    assert out_r.shape == (13, n_class)
    assert jnp.allclose(out_r, ref[:13], atol=1e-4, rtol=1e-4)

    # 3) K-tiled accumulator path (in_dim=256, block_k=128 -> 2 K steps).
    in_dim2 = 256
    bound2 = 1.0 / (in_dim2 ** 0.5)
    weight2 = jax.random.uniform(kw2, (n_class, in_dim2), jnp.float32, -bound2, bound2)
    x2 = jax.random.normal(kx2, (batch, in_dim2), jnp.float32)
    ref2 = x2 @ weight2.T + bias
    w_p2, b_p2, nc2 = prepare_logistic_params(weight2, bias)
    out2 = jax.block_until_ready(
        logistic_regression_forward(x2, w_p2, b_p2, nc2, block_k=128))
    assert jnp.allclose(out2, ref2, atol=1e-4, rtol=1e-4)

    print("KERNEL_OK")
</pallas_src>

<mosaic_0001>
module attributes {stable_mosaic.version = 11 : i64} {
  func.func @_linear_kernel(%arg0: i32, %arg1: i32, %arg2: memref<16x64xf32, #tpu.memory_space<vmem>>, %arg3: memref<64x128xf32, #tpu.memory_space<vmem>>, %arg4: memref<1x128xf32, #tpu.memory_space<vmem>>, %arg5: memref<16x10xf32, #tpu.memory_space<vmem>>, %arg6: memref<16x128xf32, #tpu.memory_space<vmem>>) attributes {dimension_semantics = [#tpu.dimension_semantics<parallel>, #tpu.dimension_semantics<arbitrary>], iteration_bounds = array<i64: 2, 1>, scalar_prefetch = 0 : i64, scratch_operands = 1 : i64, tpu.core_type = #tpu.core_type<tc>, window_params = [{transform_indices = @transform_0, window_bounds = array<i64: 16, 64>}, {transform_indices = @transform_1, window_bounds = array<i64: 64, 128>}, {pipeline_mode = #tpu.pipeline_mode<synchronous>, transform_indices = @transform_2, window_bounds = array<i64: 1, 128>}, {transform_indices = @transform_3, window_bounds = array<i64: 16, 10>}]} {
    %c0_i32 = arith.constant 0 : i32
    %0 = arith.cmpi eq, %arg1, %c0_i32 : i32
    %1 = arith.extui %0 : i1 to i32
    %c0_i32_0 = arith.constant 0 : i32
    %2 = arith.cmpi ne, %1, %c0_i32_0 : i32
    scf.if %2 {
      %c0_10 = arith.constant 0 : index
      %c0_11 = arith.constant 0 : index
      %12 = vector.load %arg4[%c0_10, %c0_11] : memref<1x128xf32, #tpu.memory_space<vmem>>, vector<1x128xf32>
      %13 = vector.shape_cast %12 : vector<1x128xf32> to vector<1x128xf32>
      %14 = vector.broadcast %13 : vector<1x128xf32> to vector<16x128xf32>
      %c0_12 = arith.constant 0 : index
      %c0_13 = arith.constant 0 : index
      %15 = vector.load %arg6[%c0_12, %c0_13] : memref<16x128xf32, #tpu.memory_space<vmem>>, vector<16x128xf32>
      tpu.vector_store %arg6[%c0_12, %c0_13], %14 {strides = array<i32>} : memref<16x128xf32, #tpu.memory_space<vmem>>, vector<16x128xf32>,
    } else {
    }
    %c0 = arith.constant 0 : index
    %c0_1 = arith.constant 0 : index
    %3 = vector.load %arg6[%c0, %c0_1] : memref<16x128xf32, #tpu.memory_space<vmem>>, vector<16x128xf32>
    %c0_2 = arith.constant 0 : index
    %c0_3 = arith.constant 0 : index
    %4 = vector.load %arg2[%c0_2, %c0_3] : memref<16x64xf32, #tpu.memory_space<vmem>>, vector<16x64xf32>
    %c0_4 = arith.constant 0 : index
    %c0_5 = arith.constant 0 : index
    %5 = vector.load %arg3[%c0_4, %c0_5] : memref<64x128xf32, #tpu.memory_space<vmem>>, vector<64x128xf32>
    %cst = arith.constant dense<0.000000e+00> : vector<16x128xf32>
    %6 = tpu.matmul %4, %5, %cst {dimension_numbers = #tpu.dot_dimension_numbers<[1], [0], [0], [1], [0, 0, 1, 1], [], []>, precision = #tpu.contract_precision<fp32>} : vector<16x64xf32>, vector<64x128xf32>, vector<16x128xf32> -> vector<16x128xf32>
    %7 = arith.addf %3, %6 : vector<16x128xf32>
    %c0_6 = arith.constant 0 : index
    %c0_7 = arith.constant 0 : index
    %8 = vector.load %arg6[%c0_6, %c0_7] : memref<16x128xf32, #tpu.memory_space<vmem>>, vector<16x128xf32>
    tpu.vector_store %arg6[%c0_6, %c0_7], %7 {strides = array<i32>} : memref<16x128xf32, #tpu.memory_space<vmem>>, vector<16x128xf32>,
    %c0_i32_8 = arith.constant 0 : i32
    %9 = arith.cmpi eq, %arg1, %c0_i32_8 : i32
    %10 = arith.extui %9 : i1 to i32
    %c0_i32_9 = arith.constant 0 : i32
    %11 = arith.cmpi ne, %10, %c0_i32_9 : i32
    scf.if %11 {
      %c0_10 = arith.constant 0 : index
      %c0_11 = arith.constant 0 : index
      %12 = vector.load %arg6[%c0_10, %c0_11] : memref<16x128xf32, #tpu.memory_space<vmem>>, vector<16x128xf32>
      %13 = vector.extract_strided_slice %12 {offsets = [0, 0], sizes = [16, 10], strides = [1, 1]} : vector<16x128xf32> to vector<16x10xf32>
      %c0_12 = arith.constant 0 : index
      %c0_13 = arith.constant 0 : index
      %14 = vector.load %arg5[%c0_12, %c0_13] : memref<16x10xf32, #tpu.memory_space<vmem>>, vector<16x10xf32>
      tpu.vector_store %arg5[%c0_12, %c0_13], %13 {strides = array<i32>} : memref<16x10xf32, #tpu.memory_space<vmem>>, vector<16x10xf32>,
    } else {
    }
    return
  }
  func.func @transform_0(%arg0: i32, %arg1: i32) -> (i32, i32) {
    %c0_i32 = arith.constant 0 : i32
    return %arg0, %arg1 : i32, i32
  }
  func.func @transform_1(%arg0: i32, %arg1: i32) -> (i32, i32) {
    %c0_i32 = arith.constant 0 : i32
    %c0_i32_0 = arith.constant 0 : i32
    return %arg1, %c0_i32 : i32, i32
  }
  func.func @transform_2(%arg0: i32, %arg1: i32) -> (i32, i32) {
    %c0_i32 = arith.constant 0 : i32
    %c0_i32_0 = arith.constant 0 : i32
    %c0_i32_1 = arith.constant 0 : i32
    return %c0_i32, %c0_i32_0 : i32, i32
  }
  func.func @transform_3(%arg0: i32, %arg1: i32) -> (i32, i32) {
    %c0_i32 = arith.constant 0 : i32
    %c0_i32_0 = arith.constant 0 : i32
    return %arg0, %c0_i32 : i32, i32
  }
}

</mosaic_0001>

<bundles_post_ra>
// kernel: tpu_custom_call.1
= control target key start
LH: loop header
LB: loop body
LE: loop exit
PB: predicated region body
PF: predicated region fallthrough
CT: control target
= control target key end

     0   :  { %8 = vsyncpa [#allocation4], 0  ;;  %s1100_s0 = inlined_call_operand.hbm [shape: f32[32,64], index: 0, kind: input, shape index: {}]   ;;  %s1101_s1 = inlined_call_operand.hbm [shape: f32[64,128], index: 1, kind: input, shape index: {}]   ;;  %s1102_s2 = inlined_call_operand.vmem [shape: f32[1,128], index: 2, kind: input, shape index: {}]   ;;  %s1103_s3 = inlined_call_operand.vmem [shape: f32[32,10], index: 3, kind: output, shape index: {}]  }
   0x1   :  { %10 = vsyncpa [#allocation4 + $0x1], 0 }
   0x2   :  { %11 = vsyncpa [#allocation6], 0  ;;  %s875_s12 = smov 0   ;;  %s877_s13 = smov 0  }
   0x3   :  { %s879_s14 = smov 0   ;;  %s881_s15 = smov 0  }
   0x4   :  { %s883_s16 = smov 0   ;;  %s885_s17 = smov 0  }
   0x5 LB: > { %s635_s18 = sadd.s32 4294967295, %s850_s17   ;;  %p51_p0 = scmp.ne.s32.totalorder %s834_s13, %s830_s12  ;;  %s850_s17 = sphi %s885_s17, %s17_s17   ;;  %s846_s16 = sphi %s883_s16, %s1112_s16   ;;  %s842_s15 = sphi %s881_s15, %s1111_s15   ;;  %s838_s14 = sphi %s879_s14, %s1110_s14   ;;  %s834_s13 = sphi %s877_s13, %s1109_s13   ;;  %s830_s12 = sphi %s875_s12, %s1108_s12  }
   0x6   : > { %p905_p1 = scmp.eq.s32.totalorder %s635_s18, 0  ;;  %p637_p2 = scmp.ge.s32.totalorder %s850_s17, 1 }
   0x7   : > { %p135_p3 = scmp.lt.s32.totalorder %s850_s17, 3  ;;  %s149_s23 = sshll.u32 %s1101_s1, 4  ;;  %s150_s23 = int_to_ptr.hbm [resolvable:$true] %s149_s23 }
   0x8   : > { %p913_p4 = por %p905_p1, %p51_p0  ;;  %s852_s25 = smov [#allocation5]  }
   0x9   : > { %p920_p5 = pnand %p637_p2, %p135_p3  ;;  %s151_s26 = sshll.u32 %s852_s25, 4  ;;  %s152_s26 = int_to_ptr.vmem [resolvable:$true] %s151_s26 }
   0xa   : > { %s853_s27 = smov 128   ;;  %s854_s28 = smov 8  }
   0xb   : > { %p673_p6 = pneg %p920_p5  ;;  %s29_s29 = sadd.s32 1, %s846_s16 }
   0xc   : > { %p31_p8 = scmp.ge.s32.totalorder %s29_s29, 2  ;;  %p45_p9 = scmp.ne.s32.totalorder %s838_s14, %s834_s13 }
   0xd   : > { %p674_p7 = pnand %p673_p6, %p905_p1  ;;  %p46_p10 = scmp.eq.s32.totalorder %s850_s17, 0 }
   0xe   : > { %s1114_s29 = smov (%p31_p8, %s29_s29), 0  ;;  %s38_s30 = sadd.s32 1, %s838_s14 }
   0xf   : > { %676 = dma.hbm_to_vmem [thread:$0]  (!%p674_p7), %s150_s23, 1024, %s152_s26, [#allocation6], %s853_s27, %s853_s27, %s854_s28  }
  0x10   : > { %p935_p11 = por %p46_p10, %p45_p9  ;;  %s33_s5 = ssub.s32 %s846_s16, %s1114_s29 }
  0x11   : > { %s168_s6 = sand.u32 1, %s838_s14   ;;  %p36_p12 = scmp.eq.s32.totalorder %s33_s5, 0 }
  0x12   : > { %p682_p13 = scmp.lt.s32.totalorder %s850_s17, 2  ;;  %s640_s7 = sshll.u32 %s168_s6, 4 }
  0x13   : > { %s650_s8 = sshll.u32 %s846_s16, 4  ;;  %s172_s21 = scalar_lea.vmem [#allocation3], %s640_s7 }
  0x14   : > { %s945_s9 = scalar_select %p36_p12, %s838_s14, %s38_s30  }
  0x15   : > { %s178_s12 = scalar_lea.hbm %s1100_s0, %s650_s8  ;;  %s181_s22 = sshll.u32 %s172_s21, 4  ;;  %s182_s22 = int_to_ptr.vmem [resolvable:$true] %s181_s22 }
  0x16   : > { %s179_s18 = sshll.u32 %s178_s12, 4  ;;  %p678_p0 = pnand %p682_p13, %p935_p11  ;;  %s180_s18 = int_to_ptr.hbm [resolvable:$true] %s179_s18 }
  0x17   : > { %s169_s23 = scalar_lea.sflag [#allocation4], %s168_s6  ;;  %193 = sbr.rel (%p920_p5) target bundleno = 210 (0xd2), region = 32 }
  0x18   : > { %680 = dma.hbm_to_vmem [thread:$0]  (!%p678_p0), %s180_s18, 256, %s182_s22, %s169_s23, %s853_s27, %s853_s27, %s854_s28  }
  0x19   : > { %s195_s25 = sand.u32 (!%p920_p5), 1, %s834_s13  }
  0x1a   : > { %s955_s26 = sshll.u32 (!%p920_p5), %s195_s25, 4  ;;  %s196_s30 = scalar_lea.sflag (!%p920_p5), [#allocation4], %s195_s25 }
  0x1b   : > { %s199_s5 = scalar_lea.vmem (!%p920_p5), [#allocation3], %s955_s26 }
  0x1c   : > { %821 = dma.done.wait (%p913_p4), %s196_s30, 256  }
  0x1d   : > { %823 = vsyncadd (%p913_p4), %s196_s30, 4294967040 }
  0x1e   : > { %825 = dma.done.wait (%p905_p1), [#allocation6], 1024  }
  0x1f   : > { %827 = vsyncadd (%p905_p1), [#allocation6], 4294966272  ;;  %v257_v0 = vld [vmem:[#allocation5 + $0x38] sm:$0xff]  ;;  %v256_v1 = vld [vmem:[#allocation5 + $0x30] sm:$0xff]  ;;  %vm258_vm0 = vcmask 523264   ;;  %s646_s19 = sshll.u32 %s842_s15, 1 }
  0x20   : > { %v255_v2 = vld [vmem:[#allocation5 + $0x28] sm:$0xff]  ;;  %v966_v3 = vand.u32 4294901760, %v257_v0  ;;  %v968_v4 = vand.u32 4294901760, %v256_v1  ;;  %v254_v6 = vld [vmem:[#allocation5 + $0x20] sm:$0xff]  ;;  %v253_v7 = vld [vmem:[#allocation5 + $0x18] sm:$0xff]  ;;  %p231_p1 = scmp.lt.s32.totalorder %s646_s19, 3 }
  0x21   : > { %v970_v5 = vand.u32 4294901760, %v255_v2  ;;  %v252_v8 = vld [vmem:[#allocation5 + $0x10] sm:$0xff]  ;;  %v972_v9 = vand.u32 4294901760, %v254_v6  ;;  %v974_v10 = vand.u32 4294901760, %v253_v7  ;;  %v251_v12 = vld [vmem:[#allocation5 + $0x8] sm:$0xff]  ;;  %v250_v13 = vld [vmem:[#allocation5] sm:$0xff] }
  0x22   : > { %v976_v11 = vand.u32 4294901760, %v252_v8  ;;  %274 = vmatpush.msra.mxu0 %v966_v3  ;;  %v315_v14 = vsub.f32 %v257_v0, %v966_v3  ;;  %v321_v15 = vsub.f32 %v256_v1, %v968_v4  ;;  %423 = vmatpush.msra.mxu3 %v966_v3  ;;  %v983_v17 = vand.u32 4294901760, %v251_v12  ;;  %v248_v18 = vld [vmem:[%s199_s5] sm:$0xff]  ;;  %v249_v36 = vld [vmem:[%s199_s5 + $0x8] sm:$0xff]  ;;  %s1116_s19 = smov (!%p231_p1, %s646_s19), 3 }
  0x23   : > { %v327_v16 = vsub.f32 %v255_v2, %v970_v5  ;;  %v333_v19 = vsub.f32 %v254_v6, %v972_v9  ;;  %v339_v20 = vsub.f32 %v253_v7, %v974_v10  ;;  %v989_v21 = vand.u32 4294901760, %v250_v13  ;;  %s647_s20 = sshll.u32 %s1116_s19, 3 }
  0x24   : > { %276 = vmatpush.msra.mxu0 %v968_v4  ;;  %381 = vmatpush.msra.mxu2 %v315_v14  ;;  %v992_v22 = vand.u32 4294901760, %v315_v14  ;;  %v994_v23 = vand.u32 4294901760, %v321_v15  ;;  %v345_v25 = vsub.f32 %v252_v8, %v976_v11  ;;  %v351_v27 = vsub.f32 %v251_v12, %v983_v17  ;;  %s234_s4 = scalar_lea.vmem %s1103_s3, %s647_s20 }
  0x25   : > { %v996_v24 = vand.u32 4294901760, %v327_v16  ;;  %425 = vmatpush.msra.mxu3 %v968_v4  ;;  %v1000_v26 = vand.u32 4294901760, %v333_v19  ;;  %v260_v28 = vsel %vm258_vm0, %v248_v18, 0  ;;  %v1004_v29 = vand.u32 4294901760, %v339_v20 }
  0x26   : > { %278 = vmatpush.msra.mxu0 %v970_v5  ;;  %384 = vmatpush.msra.mxu2 %v321_v15  ;;  %v317_v30 = vsub.f32 %v315_v14, %v992_v22  ;;  %v323_v31 = vsub.f32 %v321_v15, %v994_v23  ;;  %v1010_v33 = vand.u32 4294901760, %v260_v28  ;;  %v357_v35 = vsub.f32 %v250_v13, %v989_v21  ;;  %v735_v14 = vld [vmem:[%s1102_s2] ss:$0 sm:$0xff] }
  0x27   : > { %v329_v32 = vsub.f32 %v327_v16, %v996_v24  ;;  %427 = vmatpush.msra.mxu3 %v970_v5  ;;  %v335_v34 = vsub.f32 %v333_v19, %v1000_v26  ;;  %v1019_v40 = vand.u32 4294901760, %v345_v25  ;;  %v341_v41 = vsub.f32 %v339_v20, %v1004_v29 }
  0x28   : > { %280 = vmatpush.msra.mxu0 %v972_v9  ;;  %387 = vmatpush.msra.mxu2 %v327_v16  ;;  %v318_v37 = vand.u32 4294901760, %v317_v30  ;;  %v324_v38 = vand.u32 4294901760, %v323_v31  ;;  %v290_v39 = vsub.f32 %v260_v28, %v1010_v33  ;;  %v1024_v44 = vand.u32 4294901760, %v351_v27 }
  0x29   : > { %429 = vmatpush.msra.mxu3 %v972_v9  ;;  %v330_v42 = vand.u32 4294901760, %v329_v32  ;;  %v263_v45 = vsel %vm258_vm0, %v249_v36, 0  ;;  %v336_v47 = vand.u32 4294901760, %v335_v34  ;;  %v347_v49 = vsub.f32 %v345_v25, %v1019_v40 }
  0x2a   : > { %282 = vmatpush.msra.mxu0 %v974_v10  ;;  %319 = vmatpush.msra.mxu1 %v318_v37  ;;  %v291_v43 = vand.u32 4294901760, %v290_v39  ;;  %v1028_v46 = vand.u32 4294901760, %v263_v45  ;;  %v358_v50 = vand.u32 4294901760, %v357_v35  ;;  %v342_v53 = vand.u32 4294901760, %v341_v41 }
  0x2b   : > { %390 = vmatpush.msra.mxu2 %v333_v19  ;;  %431 = vmatpush.msra.mxu3 %v974_v10  ;;  %v353_v54 = vsub.f32 %v351_v27, %v1024_v44  ;;  %v348_v56 = vand.u32 4294901760, %v347_v49  ;;  %vm542_vm1 = vcmask 80896  }
  0x2c   : > { %284 = vmatpush.msra.mxu0 %v976_v11  ;;  %325 = vmatpush.msra.mxu1 %v324_v38  ;;  %v292_v48 = vsub.f32 %v290_v39, %v291_v43  ;;  %v298_v51 = vsub.f32 %v263_v45, %v1028_v46  ;;  %v359_v57 = vsub.f32 %v357_v35, %v358_v50 }
  0x2d   : > { %393 = vmatpush.msra.mxu2 %v339_v20  ;;  %433 = vmatpush.msra.mxu3 %v976_v11  ;;  %v354_v58 = vand.u32 4294901760, %v353_v54 }
  0x2e   : > { %286 = vmatpush.msra.mxu0 %v983_v17  ;;  %331 = vmatpush.msra.mxu1 %v330_v42  ;;  %v293_v52 = vand.u32 4294901760, %v292_v48  ;;  %v299_v55 = vand.u32 4294901760, %v298_v51  ;;  %v360_v60 = vand.u32 4294901760, %v359_v57 }
  0x2f   : > { %396 = vmatpush.msra.mxu2 %v345_v25  ;;  %435 = vmatpush.msra.mxu3 %v983_v17 }
  0x30   : > { %288 = vmatpush.msra.mxu0 %v989_v21  ;;  %337 = vmatpush.msra.mxu1 %v336_v47  ;;  %v300_v59 = vsub.f32 %v298_v51, %v299_v55 }
  0x31   : > { %399 = vmatpush.msra.mxu2 %v351_v27  ;;  %294 = vmatmul.f32.vlgmr.msra.gmra.mxu0 %v293_v52 }
  0x32   : > { %343 = vmatpush.msra.mxu1 %v342_v53  ;;  %462 = vmatpush.msrb.mxu0 %v992_v22  ;;  %v301_v61 = vand.u32 4294901760, %v300_v59 }
  0x33   : > { %402 = vmatpush.msra.mxu2 %v357_v35  ;;  %437 = vmatpush.msra.mxu3 %v989_v21 }
  0x34   : > { %405 = vmatmul.f32.vlgmr.msra.gmra.mxu2 %v290_v39  ;;  %349 = vmatpush.msra.mxu1 %v348_v56 }
  0x35   : > { %651 = vmatpush.msrb.mxu2 %v992_v22  ;;  %466 = vmatpush.msrb.mxu0 %v994_v23 }
  0x36   : > { %441 = vmatmul.f32.vlgmr.msra.gmra.mxu3 %v291_v43  ;;  %355 = vmatpush.msra.mxu1 %v354_v58 }
  0x37   : > { %652 = vmatpush.msrb.mxu2 %v994_v23  ;;  %659 = vmatpush.msrb.mxu3 %v966_v3 }
  0x38   : > { %470 = vmatpush.msrb.mxu0 %v996_v24  ;;  %361 = vmatpush.msra.mxu1 %v360_v60 }
  0x39   : > { %653 = vmatpush.msrb.mxu2 %v996_v24  ;;  %660 = vmatpush.msrb.mxu3 %v968_v4 }
  0x3a   : > { %474 = vmatpush.msrb.mxu0 %v1000_v26  ;;  %363 = vmatmul.f32.vlgmr.msra.gmra.mxu1 %v1010_v33 }
  0x3b   : > { %302 = vmatmul.f32.gmra.mxu0 %v301_v61  ;;  %654 = vmatpush.msrb.mxu2 %v1000_v26 }
  0x3c   : > { %661 = vmatpush.msrb.mxu3 %v970_v5  ;;  %478 = vmatpush.msrb.mxu0 %v1004_v29 }
  0x3d   : > { %509 = vmatpush.msrb.mxu1 %v966_v3  ;;  %410 = vmatmul.f32.gmra.mxu2 %v298_v51 }
  0x3e   : > { %655 = vmatpush.msrb.mxu2 %v1004_v29  ;;  %662 = vmatpush.msrb.mxu3 %v972_v9 }
  0x3f   : > { %482 = vmatpush.msrb.mxu0 %v1019_v40  ;;  %511 = vmatpush.msrb.mxu1 %v968_v4 }
  0x40   : > { %447 = vmatmul.f32.gmra.mxu3 %v299_v55  ;;  %656 = vmatpush.msrb.mxu2 %v1019_v40 }
  0x41   : > { %663 = vmatpush.msrb.mxu3 %v974_v10  ;;  %486 = vmatpush.msrb.mxu0 %v1024_v44 }
  0x42   : > { %513 = vmatpush.msrb.mxu1 %v970_v5  ;;  %657 = vmatpush.msrb.mxu2 %v1024_v44 }
  0x43   : > { %664 = vmatpush.msrb.mxu3 %v976_v11  ;;  %490 = vmatpush.msrb.mxu0 %v358_v50 }
  0x44   : > { %515 = vmatpush.msrb.mxu1 %v972_v9  ;;  %658 = vmatpush.msrb.mxu2 %v358_v50 }
  0x45   : > { %367 = vmatmul.f32.gmra.mxu1 %v1028_v46  ;;  %492 = vmatmul.f32.vlgmr.msrb.gmra.mxu0 %v1010_v33 }
  0x46   : > { %665 = vmatpush.msrb.mxu3 %v983_v17  ;;  %517 = vmatpush.msrb.mxu1 %v974_v10 }
  0x47   : > { %496 = vmatmul.f32.vlgmr.msrb.gmra.mxu2 %v1028_v46 }
  0x48   : > { %666 = vmatpush.msrb.mxu3 %v989_v21  ;;  %519 = vmatpush.msrb.mxu1 %v976_v11 }
  0x49   : > { %529 = vmatmul.f32.vlgmr.msrb.gmra.mxu3 %v1028_v46 }
  0x4a   : > { %521 = vmatpush.msrb.mxu1 %v983_v17 }
  0x4c   : > { %523 = vmatpush.msrb.mxu1 %v989_v21 }
  0x4d   : > { %525 = vmatmul.f32.vlgmr.msrb.gmra.mxu1 %v1010_v33 }
  0xae   : > { %v295_v62 = vpop.f32.mrf.mxu0 }
  0xb7   : > { %v406_v63 = vpop.f32.mrf.mxu2  ;;  %v364_v0 = vpop.f32.mrf.mxu1 }
  0xb8   : > { %v303_v2 = vpop.f32.mrf.mxu0  ;;  %v365_v3 = vadd.f32 %v364_v0, %v295_v62 }
  0xb9   : > { %v442_v1 = vpop.f32.mrf.mxu3 }
  0xba   : > { %v407_v6 = vadd.f32 %v406_v63, %v365_v3 }
  0xbc   : > { %v443_v11 = vadd.f32 %v442_v1, %v407_v6 }
  0xc0   : > { %v411_v4 = vpop.f32.mrf.mxu2 }
  0xc2   : > { %v368_v5 = vpop.f32.mrf.mxu1  ;;  %v493_v10 = vpop.f32.mrf.mxu0 }
  0xc3   : > { %v369_v7 = vadd.f32 %v368_v5, %v303_v2  ;;  %v448_v8 = vpop.f32.mrf.mxu3  ;;  %v494_v12 = vadd.f32 %v493_v10, %v443_v11 }
  0xc5   : > { %v412_v9 = vadd.f32 %v411_v4, %v369_v7 }
  0xc7   : > { %v449_v13 = vadd.f32 %v448_v8, %v412_v9 }
  0xca   : > { %v497_v15 = vpop.f32.mrf.mxu2  ;;  %v526_v16 = vpop.f32.mrf.mxu1 }
  0xcb   : > { %v498_v17 = vadd.f32 %v497_v15, %v449_v13  ;;  %v527_v18 = vadd.f32 %v526_v16, %v494_v12 }
  0xcc   : > { %v530_v19 = vpop.f32.mrf.mxu3 }
  0xcd   : > { %v533_v20 = vadd.f32 %v735_v14, %v527_v18  ;;  %v531_v21 = vadd.f32 %v530_v19, %v498_v17 }
  0xcf   : > { %543 = vst.msk [vmem:[%s234_s4] sm:$0xff] %vm542_vm1, %v533_v20  ;;  %v534_v22 = vadd.f32 %v735_v14, %v531_v21 }
  0xd1   : > { %544 = vst.msk [vmem:[%s234_s4 + $0x8] sm:$0xff] %vm542_vm1, %v534_v22 }
  0xd2 PF: > { %s17_s17 = sadd.s32 1, %s850_s17   ;;  %s1108_s12 = smov %s834_s13 }
  0xd3   : > { %p14_p2 = scmp.ge.s32.totalorder %s17_s17, 4   ;;  %s1109_s13 = smov %s838_s14 }
  0xd4   : > { %s1110_s14 = smov %s945_s9  ;;  %s1111_s15 = smov %s846_s16 }
  0xd5   : > { %s1112_s16 = smov %s1114_s29  ;;  %16 = sbr.rel (!%p14_p2) target bundleno = 5 (0x5), region = 85 }
  0xda   :  { %567 = vsyncpa [#allocation4], 1 }
  0xdb   :  { %569 = vsyncpa [#allocation4 + $0x1], 1 }
  0xdc   :  { %570 = vsyncpa [#allocation6], 1 }

</bundles_post_ra>
